<compile_context>
chip_gen: v5e
topology: v5e:2x2
jax: 0.10.0
libtpu: 0.0.40
codegen_flags: <defaults>
</compile_context>

<pallas_src>
import functools

import jax
import jax.numpy as jnp
from jax.experimental import pallas as pl
from jax.experimental.pallas import tpu as pltpu


def _to_map_kernel(w_ref, b_ref, x_ref, o_ref, *, use_mxu):
    # w_ref: (1, C) VMEM (resident); b_ref: (1,) SMEM; x_ref: (TN, C, THW) VMEM;
    # o_ref: (TN, 1, THW) VMEM.
    x = x_ref[...]
    b = b_ref[0]
    tn, c, _ = x_ref.shape
    if use_mxu:
        # Batched MXU contraction over C (same dot_general class as the
        # 'bqd,bkd->bqk' flash-attention pattern): (TN,1,C) x (TN,C,THW).
        w = jnp.broadcast_to(w_ref[...].astype(x.dtype), (tn, 1, c))
        s = jnp.einsum(
            "boc,bcl->bol",
            w,
            x,
            preferred_element_type=jnp.float32,
            precision=jax.lax.Precision.HIGHEST,
        )                                                      # (TN, 1, THW) f32
    else:
        # Tiny C: a few VPU fmas + one sublane (XLU) reduce; stays hidden
        # under the DMA and avoids MXU push/pop latency per spatial tile.
        w = w_ref[...].astype(jnp.float32)[0][None, :, None]   # (1, C, 1)
        s = jnp.sum(x.astype(jnp.float32) * w, axis=1, keepdims=True)
    o_ref[...] = jax.nn.sigmoid(s + b).astype(o_ref.dtype)


def _choose_tiles(N, C, HW, itemsize):
    """Pick (TN, THW): lane-dense blocks that exactly divide the array, sized
    at ~2 MiB per x block (≈4 MiB double-buffered) so the pipeline has depth
    and the footprint stays under the default scoped VMEM on all chips."""
    budget = 2 * 1024 * 1024
    if HW % 128 == 0:
        # Largest multiple of 128 dividing HW whose single-batch block fits.
        cap = (budget // max(C * itemsize, 1)) // 128 * 128
        cap = max(128, min(cap, 65536))
        thw = 128
        cand = 256
        while cand <= min(HW, cap):
            if HW % cand == 0:
                thw = cand
            cand += 128
    else:
        thw = HW  # full-extent block (always legal)
    per_batch = max(C * thw * itemsize, 1)
    tn_cap = max(1, budget // per_batch)
    tn = 1
    for cand in range(1, min(N, tn_cap) + 1):
        if N % cand == 0:
            tn = cand
    return tn, thw


def to_map_forward(x_nchw, weight, bias):
    """x_nchw: (N, C, H, W); weight: (1, C, 1, 1); bias: (1,).
    Returns sigmoid(conv1x1(x)) of shape (N, 1, H, W), dtype of x."""
    N, C, H, W = x_nchw.shape
    HW = H * W
    x = x_nchw.reshape(N, C, HW)          # keep native dtype; no upcast here
    w = weight.reshape(1, C).astype(jnp.float32)
    b = bias.reshape(1).astype(jnp.float32)

    itemsize = jnp.dtype(x.dtype).itemsize
    TN, THW = _choose_tiles(N, C, HW, itemsize)
    grid = (N // TN, HW // THW)
    use_mxu = C > 16

    cost = pl.CostEstimate(
        flops=2 * N * C * HW,
        transcendentals=N * HW,
        bytes_accessed=N * C * HW * itemsize + N * HW * itemsize + C * 4 + 4,
    )

    out = pl.pallas_call(
        functools.partial(_to_map_kernel, use_mxu=use_mxu),
        out_shape=jax.ShapeDtypeStruct((N, 1, HW), x.dtype),
        grid=grid,
        in_specs=[
            pl.BlockSpec((1, C), lambda i, j: (0, 0)),              # weight (resident)
            pl.BlockSpec(memory_space=pltpu.MemorySpace.SMEM),      # bias scalar
            pl.BlockSpec((TN, C, THW), lambda i, j: (i, 0, j)),     # x tile
        ],
        out_specs=pl.BlockSpec((TN, 1, THW), lambda i, j: (i, 0, j)),
        compiler_params=pltpu.CompilerParams(
            dimension_semantics=("parallel", "parallel")),
        cost_estimate=cost,
    )(w, b, x)

    return out.reshape(N, 1, H, W)


if __name__ == "__main__":
    # Deterministic synthetic parameters and inputs (no checkpoint loading).
    def _reference(x, weight, bias):
        C = x.shape[1]
        return jax.nn.sigmoid(
            jnp.einsum("nchw,c->nhw", x, weight.reshape(C)) + bias[0]
        )[:, None, :, :]

    def _run_case(key, N, C, H, W, atol):
        k_x, k_w, k_b = jax.random.split(key, 3)
        x = jax.random.normal(k_x, (N, C, H, W), dtype=jnp.float32)
        # Conv2d(C, 1, kernel_size=1) parameters: weight (1, C, 1, 1), bias (1,)
        weight = jax.random.normal(k_w, (1, C, 1, 1), dtype=jnp.float32) * 0.1
        bias = jax.random.normal(k_b, (1,), dtype=jnp.float32) * 0.1
        y = to_map_forward(x, weight, bias)
        jax.block_until_ready(y)
        ref = _reference(x, weight, bias)
        assert y.shape == (N, 1, H, W)
        assert jnp.allclose(y, ref, atol=atol, rtol=atol), \
            f"max err {jnp.max(jnp.abs(y - ref))}"

    key = jax.random.PRNGKey(0)
    k1, k2 = jax.random.split(key)
    _run_case(k1, N=2, C=4, H=16, W=16, atol=1e-5)    # small-C VPU reduce path
    _run_case(k2, N=2, C=64, H=16, W=16, atol=1e-4)   # large-C MXU einsum path

    print("KERNEL_OK")
</pallas_src>

<mosaic_0001>
module attributes {stable_mosaic.version = 11 : i64} {
  func.func @_to_map_kernel(%arg0: i32, %arg1: i32, %arg2: memref<1x4xf32, #tpu.memory_space<vmem>>, %arg3: memref<1xf32, #tpu.memory_space<smem>>, %arg4: memref<2x4x256xf32, #tpu.memory_space<vmem>>, %arg5: memref<2x1x256xf32, #tpu.memory_space<vmem>>) attributes {dimension_semantics = [#tpu.dimension_semantics<parallel>, #tpu.dimension_semantics<parallel>], iteration_bounds = array<i64: 1, 1>, scalar_prefetch = 0 : i64, scratch_operands = 0 : i64, tpu.core_type = #tpu.core_type<tc>, window_params = [{pipeline_mode = #tpu.pipeline_mode<synchronous>, transform_indices = @transform_0, window_bounds = array<i64: 1, 4>}, {transform_indices = @transform_1, window_bounds = array<i64: 1>}, {transform_indices = @transform_2, window_bounds = array<i64: 2, 4, 256>}, {transform_indices = @transform_3, window_bounds = array<i64: 2, 1, 256>}]} {
    %c0 = arith.constant 0 : index
    %c0_0 = arith.constant 0 : index
    %c0_1 = arith.constant 0 : index
    %0 = vector.load %arg4[%c0, %c0_0, %c0_1] : memref<2x4x256xf32, #tpu.memory_space<vmem>>, vector<2x4x256xf32>
    %c0_2 = arith.constant 0 : index
    %1 = memref.load %arg3[%c0_2] : memref<1xf32, #tpu.memory_space<smem>>
    %c0_3 = arith.constant 0 : index
    %c0_4 = arith.constant 0 : index
    %2 = vector.load %arg2[%c0_3, %c0_4] : memref<1x4xf32, #tpu.memory_space<vmem>>, vector<1x4xf32>
    %3 = vector.shape_cast %2 : vector<1x4xf32> to vector<4xf32>
    %4 = vector.shape_cast %3 : vector<4xf32> to vector<1x4x1xf32>
    %5 = vector.broadcast %4 : vector<1x4x1xf32> to vector<2x4x256xf32>
    %6 = arith.mulf %0, %5 : vector<2x4x256xf32>
    %cst = arith.constant dense<0.000000e+00> : vector<2x256xf32>
    %7 = vector.multi_reduction <add>, %6, %cst [1] : vector<2x4x256xf32> to vector<2x256xf32>
    %8 = vector.shape_cast %7 : vector<2x256xf32> to vector<2x1x256xf32>
    %9 = vector.broadcast %1 : f32 to vector<2x1x256xf32>
    %10 = arith.addf %8, %9 : vector<2x1x256xf32>
    %11 = arith.negf %10 : vector<2x1x256xf32>
    %12 = math.exp %11 : vector<2x1x256xf32>
    %cst_5 = arith.constant 1.000000e+00 : f32
    %13 = vector.broadcast %cst_5 : f32 to vector<2x1x256xf32>
    %14 = arith.addf %13, %12 : vector<2x1x256xf32>
    %15 = arith.divf %13, %14 : vector<2x1x256xf32>
    %c0_6 = arith.constant 0 : index
    %c0_7 = arith.constant 0 : index
    %c0_8 = arith.constant 0 : index
    %16 = vector.load %arg5[%c0_6, %c0_7, %c0_8] : memref<2x1x256xf32, #tpu.memory_space<vmem>>, vector<2x1x256xf32>
    tpu.vector_store %arg5[%c0_6, %c0_7, %c0_8], %15 {strides = array<i32>} : memref<2x1x256xf32, #tpu.memory_space<vmem>>, vector<2x1x256xf32>,
    return
  }
  func.func @transform_0(%arg0: i32, %arg1: i32) -> (i32, i32) {
    %c0_i32 = arith.constant 0 : i32
    %c0_i32_0 = arith.constant 0 : i32
    %c0_i32_1 = arith.constant 0 : i32
    return %c0_i32, %c0_i32_0 : i32, i32
  }
  func.func @transform_1(%arg0: i32, %arg1: i32) -> i32 {
    %c0_i32 = arith.constant 0 : i32
    %c0_i32_0 = arith.constant 0 : i32
    return %c0_i32 : i32
  }
  func.func @transform_2(%arg0: i32, %arg1: i32) -> (i32, i32, i32) {
    %c0_i32 = arith.constant 0 : i32
    %c0_i32_0 = arith.constant 0 : i32
    return %arg0, %c0_i32, %arg1 : i32, i32, i32
  }
  func.func @transform_3(%arg0: i32, %arg1: i32) -> (i32, i32, i32) {
    %c0_i32 = arith.constant 0 : i32
    %c0_i32_0 = arith.constant 0 : i32
    return %arg0, %c0_i32, %arg1 : i32, i32, i32
  }
}

</mosaic_0001>

<bundles_post_ra>
// kernel: tpu_custom_call.1
= control target key start
LH: loop header
LB: loop body
LE: loop exit
PB: predicated region body
PF: predicated region fallthrough
CT: control target
= control target key end

     0   :  { %9 = vsyncpa [#allocation4], 0  ;;  %s372_s0 = inlined_call_operand.vmem [shape: f32[1,4], index: 0, kind: input, shape index: {}]   ;;  %s373_s1 = inlined_call_operand.<no memory space> [shape: f32[1], index: 1, kind: input, shape index: {}]   ;;  %s374_s2 = inlined_call_operand.hbm [shape: f32[2,4,256], index: 2, kind: input, shape index: {}]   ;;  %s375_s3 = inlined_call_operand.hbm [shape: f32[2,1,256], index: 3, kind: output, shape index: {}]  }
   0x1   :  { %10 = vsyncpa [#allocation5], 0  ;;  %s19_s14 = sshll.u32 %s374_s2, 4  ;;  %s291_s15 = smov [#allocation3]   ;;  %s20_s14 = int_to_ptr.hbm [resolvable:$true] %s19_s14 }
   0x2   :  { %s21_s16 = sshll.u32 %s291_s15, 4  ;;  %s292_s17 = smov 128   ;;  %s22_s16 = int_to_ptr.vmem [resolvable:$true] %s21_s16 }
   0x3   :  { %s293_s18 = smov 8  }
   0x4   :  { %27 = dma.hbm_to_vmem [thread:$0]  %s20_s14, 256, %s22_s16, [#allocation4], %s292_s17, %s292_s17, %s293_s18  }
   0x5   :  { %287 = dma.done.wait [#allocation4], 256  }
   0x6   :  { %288 = vsyncadd [#allocation4], 4294967040  ;;  %v37_v0 = vlaneseq  ;;  %v222_v2 = vld [vmem:[%s372_s0] ss:$0 sm:$0xff]  ;;  %v294_v3 = vmov 839922192   ;;  %v93_v40 = vstv %s373_s1 }
   0x7   :  { %v45_v4 = vunpack.c.l.s4 %v294_v3  ;;  %v32_v7 = vld [vmem:[#allocation3] sm:$0xff]  ;;  %v33_v8 = vld [vmem:[#allocation3 + $0x8] sm:$0xff]  ;;  %vm64_vm0 = vcmask 1043456   ;;  %vm180_vm2 = vcmask 1040384   ;;  %s295_s1 = smov [#allocation6]   ;;  %s197_s24 = sshll.u32 %s375_s3, 4  ;;  %s198_s24 = int_to_ptr.hbm [resolvable:$true] %s197_s24 }
   0x8   :  { %v38_v1 = vshrl.u32 %v37_v0, 7  ;;  %vm356_vm14 = vcmp.lt.s32.totalorder %v37_v0, 256  ;;  %s195_s21 = sshll.u32 %s295_s1, 4  ;;  %s296_s3 = smov 32   ;;  %s196_s21 = int_to_ptr.vmem [resolvable:$true] %s195_s21 }
   0x9   :  { %v46_v5 = vunpack.c.0.s8 %v45_v4  ;;  %s297_s25 = smov 2  }
   0xa   :  { %221 = vset.pattern.permute.xlu0 %v38_v1 }
  0x12   :  { %41 = vperm.xlu0 %221, %v222_v2  }
  0x84   :  { %v42_v6 = vpop.permute.xlu0 %41 }
  0x85   :  { %v47_v9 = vperm.slane %v42_v6, %v46_v5 }
  0x87   :  { %v49_v10 = vmul.f32 %v47_v9, %v32_v7  ;;  %v50_v11 = vmul.f32 %v47_v9, %v33_v8 }
  0x89   :  { %53 = vst [vmem:[#allocation1] ss:$2 sm:$0xff] %v49_v10 }
  0x8a   :  { %57 = vst [vmem:[#allocation1 + $0x10] ss:$2 sm:$0xff] %v50_v11 }
  0x90   :  { %v54_v12 = vld.sshfl [vmem:[#allocation1] sm:$0xff pattern:$0x75316420]  ;;  %v55_v13 = vld.sshfl [vmem:[#allocation1 + $0x8] sm:$0xff pattern:$0x75316420] }
  0x91   :  { %v58_v14 = vld.sshfl [vmem:[#allocation1 + $0x10] sm:$0xff pattern:$0x75316420]  ;;  %v59_v15 = vld.sshfl [vmem:[#allocation1 + $0x18] sm:$0xff pattern:$0x75316420] }
  0x92   :  { %v65_v16 = vsel %vm64_vm0, %v54_v12, 0.0  ;;  %v72_v17 = vsel %vm64_vm0, %v55_v13, 0.0  ;;  %v79_v18 = vsel %vm64_vm0, %v58_v14, 0.0  ;;  %v86_v19 = vsel %vm64_vm0, %v59_v15, 0.0 }
  0x93   :  { %v66_v20 = vrot.slane %v65_v16, 4  ;;  %v73_v21 = vrot.slane %v72_v17, 4  ;;  %v80_v22 = vrot.slane %v79_v18, 4  ;;  %v87_v23 = vrot.slane %v86_v19, 4 }
  0x95   :  { %v67_v24 = vadd.f32 %v66_v20, %v65_v16  ;;  %v74_v25 = vadd.f32 %v73_v21, %v72_v17  ;;  %v81_v26 = vadd.f32 %v80_v22, %v79_v18  ;;  %v88_v27 = vadd.f32 %v87_v23, %v86_v19 }
  0x97   :  { %v75_v28 = vrot.slane %v74_v25, 2  ;;  %v89_v29 = vrot.slane %v88_v27, 2  ;;  %v68_v30 = vrot.slane %v67_v24, 2  ;;  %v82_v31 = vrot.slane %v81_v26, 2 }
  0x99   :  { %v76_v32 = vadd.f32 %v75_v28, %v74_v25  ;;  %v90_v33 = vadd.f32 %v89_v29, %v88_v27  ;;  %v69_v34 = vadd.f32 %v68_v30, %v67_v24  ;;  %v83_v35 = vadd.f32 %v82_v31, %v81_v26 }
  0x9b   :  { %v70_v36 = vrot.slane %v69_v34, 1  ;;  %v77_v37 = vrot.slane %v76_v32, 1  ;;  %v84_v38 = vrot.slane %v83_v35, 1  ;;  %v91_v39 = vrot.slane %v90_v33, 1 }
  0x9d   :  { %v71_v41 = vadd.f32 %v70_v36, %v69_v34  ;;  %v78_v42 = vadd.f32 %v77_v37, %v76_v32  ;;  %v85_v43 = vadd.f32 %v84_v38, %v83_v35  ;;  %v92_v44 = vadd.f32 %v91_v39, %v90_v33 }
  0x9f   :  { %v94_v45 = vadd.f32 %v93_v40, %v71_v41  ;;  %v95_v46 = vadd.f32 %v93_v40, %v78_v42  ;;  %v96_v47 = vadd.f32 %v93_v40, %v85_v43  ;;  %v97_v48 = vadd.f32 %v93_v40, %v92_v44 }
  0xa1   :  { %v210_v49 = vmul.f32 -1.442695, %v94_v45  ;;  %v211_v50 = vmul.f32 -1.442695, %v95_v46  ;;  %v212_v51 = vmul.f32 -1.442695, %v96_v47 }
  0xa2   :  { %v213_v52 = vmul.f32 -1.442695, %v97_v48 }
  0xa3   :  { %223 = vpow2.f32 %v210_v49 }
  0xa4   :  { %225 = vpow2.f32 %v211_v50 }
  0xa5   :  { %227 = vpow2.f32 %v212_v51 }
  0xa6   :  { %229 = vpow2.f32 %v213_v52 }
  0xa9   :  { %v224_v53 = vpop.eup %223 }
  0xaa   :  { %v226_v54 = vpop.eup %225  ;;  %v110_v55 = vadd.f32 1.0, %v224_v53 }
  0xab   :  { %v228_v56 = vpop.eup %227  ;;  %v111_v57 = vadd.f32 1.0, %v226_v54 }
  0xac   :  { %v230_v58 = vpop.eup %229  ;;  %v328_v59 = vadd.f32 1.0, %v228_v56  ;;  %231 = vrcp.f32 %v110_v55  ;;  %v125_v2 = vand.u32 2147483648, %v110_v55  ;;  %vm119_vm1 = vweird.f32 %v110_v55 }
  0xad   :  { %v113_v60 = vadd.f32 1.0, %v230_v58  ;;  %233 = vrcp.f32 %v111_v57  ;;  %v123_v7 = vand.u32 2147483647, %v110_v55  ;;  %vm134_vm3 = vweird.f32 %v111_v57 }
  0xae   :  { %235 = vrcp.f32 %v328_v59  ;;  %v140_v9 = vand.u32 2147483648, %v111_v57  ;;  %v126_v13 = vor.u32 1.1754944e-38, %v125_v2  ;;  %v138_v15 = vand.u32 2147483647, %v111_v57 }
  0xaf   :  { %237 = vrcp.f32 %v113_v60  ;;  %vm149_vm6 = vweird.f32 %v328_v59  ;;  %v170_v22 = vand.u32 2147483648, %v113_v60  ;;  %v168_v25 = vand.u32 2147483647, %v113_v60 }
  0xb0   :  { %v141_v21 = vor.u32 1.1754944e-38, %v140_v9  ;;  %vm139_vm11 = vcmp.eq.f32.partialorder %v138_v15, 8.507059e+37  ;;  %v155_v28 = vand.u32 2147483648, %v328_v59  ;;  %v153_v31 = vand.u32 2147483647, %v328_v59 }
  0xb1   :  { %vm164_vm13 = vweird.f32 %v113_v60  ;;  %vm124_vm15 = vcmp.eq.f32.partialorder %v123_v7, 8.507059e+37  ;;  %v171_v34 = vor.u32 1.1754944e-38, %v170_v22 }
  0xb2   :  { %v232_v61 = vpop.eup %231  ;;  %v156_v0 = vor.u32 1.1754944e-38, %v155_v28 }
  0xb3   :  { %v234_v62 = vpop.eup %233  ;;  %v115_v63 = vmul.f32 %v232_v61, %v110_v55  ;;  %vm120_vm4 = vweird.f32 %v232_v61 }
  0xb4   :  { %v331_v1 = vpop.eup %235  ;;  %v130_v3 = vmul.f32 %v234_v62, %v111_v57  ;;  %vm135_vm5 = vweird.f32 %v234_v62  ;;  %vm338_vm7 = vmor %vm119_vm1, %vm120_vm4  ;;  %vm169_vm1 = vcmp.eq.f32.partialorder %v168_v25, 8.507059e+37 }
  0xb5   :  { %v116_v4 = vsub.f32 1.0, %v115_v63  ;;  %v145_v5 = vmul.f32 %v331_v1, %v328_v59  ;;  %v238_v6 = vpop.eup %237  ;;  %vm150_vm8 = vweird.f32 %v331_v1  ;;  %vm136_vm9 = vmor %vm134_vm3, %vm135_vm5  ;;  %vm154_vm3 = vcmp.eq.f32.partialorder %v153_v31, 8.507059e+37 }
  0xb6   :  { %v131_v8 = vsub.f32 1.0, %v130_v3  ;;  %v160_v12 = vmul.f32 %v238_v6, %v113_v60  ;;  %vm165_vm10 = vweird.f32 %v238_v6  ;;  %vm350_vm12 = vmor %vm149_vm6, %vm150_vm8 }
  0xb7   :  { %v117_v10 = vmul.f32 %v232_v61, %v116_v4  ;;  %v146_v11 = vsub.f32 1.0, %v145_v5  ;;  %vm166_vm0 = vmor %vm164_vm13, %vm165_vm10 }
  0xb8   :  { %v132_v14 = vmul.f32 %v234_v62, %v131_v8  ;;  %v161_v18 = vsub.f32 1.0, %v160_v12 }
  0xb9   :  { %v118_v16 = vadd.f32 %v232_v61, %v117_v10  ;;  %v147_v17 = vmul.f32 %v331_v1, %v146_v11 }
  0xba   :  { %v133_v20 = vadd.f32 %v234_v62, %v132_v14  ;;  %v162_v24 = vmul.f32 %v238_v6, %v161_v18 }
  0xbb   :  { %v148_v23 = vadd.f32 %v331_v1, %v147_v17  ;;  %v122_v26 = vsel %vm338_vm7, %v232_v61, %v118_v16 }
  0xbc   :  { %v137_v27 = vsel %vm136_vm9, %v234_v62, %v133_v20  ;;  %v163_v32 = vadd.f32 %v238_v6, %v162_v24  ;;  %v127_v36 = vsel %vm124_vm15, %v126_v13, %v122_v26 }
  0xbd   :  { %v142_v29 = vsel %vm139_vm11, %v141_v21, %v137_v27  ;;  %v152_v37 = vsel %vm350_vm12, %v331_v1, %v148_v23 }
  0xbe   :  { %v178_v35 = vrot.slane %v142_v29, 7  ;;  %v167_v38 = vsel %vm166_vm0, %v238_v6, %v163_v32  ;;  %v157_v42 = vsel %vm154_vm3, %v156_v0, %v152_v37 }
  0xbf   :  { %v172_v39 = vsel %vm169_vm1, %v171_v34, %v167_v38 }
  0xc0   :  { %v181_v40 = vsel %vm180_vm2, %v127_v36, %v178_v35  ;;  %v179_v41 = vrot.slane %v172_v39, 7 }
  0xc1   :  { %189 = vst.msk [vmem:[#allocation6] sm:$0x3] %vm356_vm14, %v181_v40 }
  0xc2   :  { %v182_v43 = vsel %vm180_vm2, %v157_v42, %v179_v41 }
  0xc3   :  { %190 = vst.msk [vmem:[#allocation6 + $0x2] sm:$0x3] %vm356_vm14, %v182_v43 }
  0xc4   :  { %203 = dma.vmem_to_hbm [thread:$0]  %s196_s21, 64, %s198_s24, [#allocation5], %s296_s3, %s296_s3, %s297_s25  }
  0xc5   :  { %289 = dma.done.wait [#allocation5], 64  }
  0xc6   :  { %290 = vsyncadd [#allocation5], 4294967232 }
  0xc7   :  { %208 = vsyncpa [#allocation4], 1 }
  0xc8   :  { %209 = vsyncpa [#allocation5], 1 }

</bundles_post_ra>
